<compile_context>
chip_gen: v7x
topology: tpu7x:2x2x1
jax: 0.10.0
libtpu: 0.0.40
codegen_flags: <defaults>
</compile_context>

<pallas_src>
import functools

import jax
import jax.numpy as jnp
from jax import lax
from jax.experimental import pallas as pl
from jax.experimental.pallas import tpu as pltpu


def _vmem_budget():
    """(per-step input-bytes target, scoped-VMEM limit) by TPU generation."""
    try:
        cap = pltpu.get_tpu_info().vmem_capacity_bytes
    except Exception:
        cap = 64 * 1024 * 1024          # unknown: stay conservative (v7x-safe)
    if cap >= 100 * 1024 * 1024:        # v5e / v6e: 128 MiB physical VMEM
        return 24 * 1024 * 1024, 64 * 1024 * 1024
    return 8 * 1024 * 1024, 32 * 1024 * 1024   # v7x: 64 MiB per TensorCore


def _iou_hist_kernel(x_ref, t_ref, out_ref, *, num_classes, s_tile, chunk,
                     hw, need_mask, targets_are_labels, carry_counts, unroll):
    # x_ref: (C, s_tile, 128) logits (native dtype).
    # t_ref: (C, s_tile, 128) one-hot targets OR (s_tile, 128) int32 labels.
    # out_ref: (3C, rows, 128) int32, rows = 1 (vreg path) or chunk (VMEM
    #          path); rows [0,C)=|pred==c|, [C,2C)=|targ==c|, [2C,3C)=inter.
    C = num_classes
    n_chunks = s_tile // chunk
    j = pl.program_id(1)

    # Same output block for every spatial tile j -> slab stays resident in
    # VMEM across j and is written back to HBM once per batch element.
    @pl.when(j == 0)
    def _zero():
        out_ref[...] = jnp.zeros_like(out_ref)

    if need_mask:
        row = lax.broadcasted_iota(jnp.int32, (chunk, 128), 0)
        col = lax.broadcasted_iota(jnp.int32, (chunk, 128), 1)
        base = j * (s_tile * 128) + row * 128 + col

    def pred_targ(i):
        s0 = pl.multiple_of(i * chunk, chunk)
        sl = pl.ds(s0, chunk)
        # Running compare-and-select argmax in the native input dtype; strict
        # ">" preserves torch.argmax's first-index tie-break.  Pure VPU work.
        best_x = x_ref[0, sl, :]
        pred = jnp.zeros((chunk, 128), jnp.int32)
        if targets_are_labels:
            targ = t_ref[sl, :]
            for c in range(1, C):
                xc = x_ref[c, sl, :]
                gx = xc > best_x
                best_x = jnp.where(gx, xc, best_x)
                pred = jnp.where(gx, jnp.int32(c), pred)
        else:
            best_t = t_ref[0, sl, :]
            targ = jnp.zeros((chunk, 128), jnp.int32)
            for c in range(1, C):
                xc = x_ref[c, sl, :]
                gx = xc > best_x
                best_x = jnp.where(gx, xc, best_x)
                pred = jnp.where(gx, jnp.int32(c), pred)
                tc = t_ref[c, sl, :]
                gt = tc > best_t
                best_t = jnp.where(gt, tc, best_t)
                targ = jnp.where(gt, jnp.int32(c), targ)
        if need_mask:
            # 128-lane pad and/or ragged last tile: push invalid positions to
            # classes that never match any histogram row (no class-0 pollution).
            invalid = (base + s0 * 128) >= hw
            pred = jnp.where(invalid, jnp.int32(-1), pred)
            targ = jnp.where(invalid, jnp.int32(-2), targ)
        return pred, targ

    if carry_counts:
        # Small/medium C: 3*C per-class (chunk,128) counters carried in vregs
        # across the chunk loop -> no VMEM read-modify-write per chunk; one
        # sublane reduction (idle XLU) + add into out_ref per grid step.
        zero = jnp.zeros((chunk, 128), jnp.int32)
        init = (tuple([zero] * C), tuple([zero] * C), tuple([zero] * C))

        def body(i, accs):
            pa, ta, ia = accs
            pred, targ = pred_targ(i)
            pa_n, ta_n, ia_n = [], [], []
            for c in range(C):
                pm = (pred == c).astype(jnp.int32)
                tm = (targ == c).astype(jnp.int32)
                pa_n.append(pa[c] + pm)
                ta_n.append(ta[c] + tm)
                ia_n.append(ia[c] + (pm & tm))
            return (tuple(pa_n), tuple(ta_n), tuple(ia_n))

        pa, ta, ia = lax.fori_loop(0, n_chunks, body, init, unroll=unroll)
        for c in range(C):
            out_ref[c] += jnp.sum(pa[c], axis=0, keepdims=True)
            out_ref[C + c] += jnp.sum(ta[c], axis=0, keepdims=True)
            out_ref[2 * C + c] += jnp.sum(ia[c], axis=0, keepdims=True)
    else:
        # Large C: carried counters would blow the 64-vreg budget; accumulate
        # into the VMEM-resident wide output slab instead.
        @pl.loop(0, n_chunks)
        def _chunk(i):
            pred, targ = pred_targ(i)
            for c in range(C):
                pm = (pred == c).astype(jnp.int32)
                tm = (targ == c).astype(jnp.int32)
                out_ref[c] += pm
                out_ref[C + c] += tm
                out_ref[2 * C + c] += (pm & tm)


def iou_histograms(logits, targets, num_classes):
    """Per-class (intersection, union) pixel counts.

    logits:  (B, C, H, W), any float dtype (consumed in its native dtype).
    targets: (B, C, H, W) one-hot (torch-parity path, argmaxed in-kernel) or
             (B, H, W) integer labels (~C x fewer target HBM bytes).
    """
    B, C, H, W = logits.shape
    assert C == num_classes, (C, num_classes)
    hw = H * W
    targets_are_labels = targets.ndim == 3

    # Native dtypes end-to-end: no wrapper .astype copy pass.  bf16 logits
    # halve the dominant HBM stream (argmax tie-breaks may then differ from a
    # f32 torch.argmax below bf16 precision).
    lg = logits.reshape(B, C, hw)
    if targets_are_labels:
        assert targets.shape == (B, H, W)
        tg = targets.reshape(B, hw)
        if tg.dtype != jnp.int32:
            tg = tg.astype(jnp.int32)
    else:
        assert targets.shape == (B, C, H, W)
        tg = targets.reshape(B, C, hw)

    # Minimal 128-lane pad of the flat spatial axis, only when required.
    # TODO(synk): the pad copies both inputs once; callers with 128-aligned
    # H*W skip it entirely.
    s = pl.cdiv(hw, 128)
    pad = s * 128 - hw
    if pad:
        lg = jnp.pad(lg, ((0, 0), (0, 0), (0, pad)))
        tg = jnp.pad(tg, ((0, 0), (0, pad)) if targets_are_labels
                     else ((0, 0), (0, 0), (0, pad)))
    lg = lg.reshape(B, C, s, 128)
    tg = tg.reshape(B, s, 128) if targets_are_labels else tg.reshape(B, C, s, 128)

    # Generation-aware spatial tiling: large blocks on 128-MiB-VMEM chips to
    # amortise the ~0.35us per-grid-step overhead, conservative on v7x.
    step_bytes, vmem_limit = _vmem_budget()
    lg_row = 128 * C * lg.dtype.itemsize
    tg_row = 128 * (4 if targets_are_labels else C * tg.dtype.itemsize)
    if s <= 8:
        s_tile = chunk = s
    else:
        rows = max(8, min(s, step_bytes // (lg_row + tg_row)))
        s_tile = max(8, (rows // 8) * 8)
        chunk = 8
    n_j = pl.cdiv(s, s_tile)
    n_chunks = s_tile // chunk
    need_mask = (pad != 0) or (s % s_tile != 0)

    # Small/medium C -> vreg-carried counters + sublane-reduced (1,128) slab;
    # large C -> VMEM slab of (chunk,128) rows per class-histogram.
    carry_counts = 3 * num_classes <= 40
    rows_out = 1 if carry_counts else chunk

    kernel = functools.partial(
        _iou_hist_kernel, num_classes=num_classes, s_tile=s_tile, chunk=chunk,
        hw=hw, need_mask=need_mask, targets_are_labels=targets_are_labels,
        carry_counts=carry_counts, unroll=2 if n_chunks >= 2 else 1)

    if targets_are_labels:
        t_spec = pl.BlockSpec((pl.Squeezed(), s_tile, 128),
                              lambda b, j: (b, j, 0))
    else:
        t_spec = pl.BlockSpec((pl.Squeezed(), C, s_tile, 128),
                              lambda b, j: (b, 0, j, 0))

    raw = pl.pallas_call(
        kernel,
        out_shape=jax.ShapeDtypeStruct((B, 3 * num_classes, rows_out, 128),
                                       jnp.int32),
        grid=(B, n_j),
        in_specs=[
            pl.BlockSpec((pl.Squeezed(), C, s_tile, 128),
                         lambda b, j: (b, 0, j, 0)),
            t_spec,
        ],
        # Same output block for every j -> accumulated in VMEM across spatial
        # tiles, written back to HBM once per batch element.
        out_specs=pl.BlockSpec((pl.Squeezed(), 3 * num_classes, rows_out, 128),
                               lambda b, j: (b, 0, 0, 0)),
        compiler_params=pltpu.CompilerParams(
            # j revisits the output block -> "arbitrary"; b stays "parallel"
            # so v7x's two TensorCores can split the batch.
            dimension_semantics=("parallel", "arbitrary"),
            vmem_limit_bytes=vmem_limit),
    )(lg, tg)

    # Tiny cross-lane / cross-batch reduction in JAX glue.  int32 counts are
    # exact for up to 2^31 pixels per call (ample for realistic B*H*W).
    hist = raw.reshape(B, 3, num_classes, rows_out * 128).sum(axis=(0, 3))
    pred_h, targ_h, inter = hist[0], hist[1], hist[2]
    union = pred_h + targ_h - inter
    return inter, union


class IOUFunc:
    """JAX/Pallas equivalent of the PyTorch IOU_func module (ignore class 0)."""

    def __init__(self, num_classes, ignore_index=(0,)):
        self.num_classes = num_classes
        self.ignore_index = tuple(ignore_index)
        keep = [c for c in range(num_classes) if c not in self.ignore_index]
        keep_idx = jnp.array(keep, dtype=jnp.int32)
        n_keep = len(keep)

        def fwd(logits, targets):
            inter, union = iou_histograms(logits, targets, num_classes)
            inter_f = inter.astype(jnp.float32)
            union_f = union.astype(jnp.float32)
            iou_all = jnp.where(union == 0, 1.0,
                                inter_f / jnp.maximum(union_f, 1.0))
            cls_iou = iou_all[keep_idx]
            mean_iou = jnp.sum(cls_iou) / n_keep
            loss = -jnp.log(mean_iou ** 2)
            return mean_iou, loss, cls_iou

        self._fwd = jax.jit(fwd)
        self.cls_iou_list = []
        self.reset()

    def reset(self):
        self.count = 0
        self.sum = 0.0

    def __call__(self, logits, targets):
        self.count += 1
        mean_iou, loss, cls_iou = self._fwd(logits, targets)
        # TODO(synk): the torch module's .item()-driven Python-float
        # bookkeeping would force a host sync per call; running stats are kept
        # as device arrays and only synced when read.
        self.sum = self.sum + mean_iou
        self.cls_iou_list.append(cls_iou)
        return mean_iou, loss, cls_iou

    def compute(self):
        iou = self.sum / self.count
        self.reset()
        return iou

    def compute_cls(self):
        cls = jnp.mean(jnp.stack(self.cls_iou_list), axis=0)
        self.cls_iou_list = []
        return [float(v) for v in cls]


def _reference_iou(logits, targets, num_classes, ignore=(0,)):
    pred = jnp.argmax(logits, axis=1)
    targ = targets if targets.ndim == 3 else jnp.argmax(targets, axis=1)
    cls_iou = []
    for c in range(num_classes):
        if c in ignore:
            continue
        pm = pred == c
        tm = targ == c
        inter = jnp.sum(pm & tm).astype(jnp.float32)
        union = jnp.sum(pm | tm).astype(jnp.float32)
        cls_iou.append(jnp.where(union == 0, 1.0, inter / jnp.maximum(union, 1.0)))
    cls_iou = jnp.stack(cls_iou)
    return jnp.sum(cls_iou) / (num_classes - len(ignore)), cls_iou


if __name__ == "__main__":
    def run_case(B, C, H, W, case_id, labels=False):
        key = jax.random.fold_in(jax.random.PRNGKey(0), case_id)
        k1, k2 = jax.random.split(key)
        logits = jax.random.normal(k1, (B, C, H, W), dtype=jnp.float32)
        lbl = jax.random.randint(k2, (B, H, W), 0, C)
        targets = lbl if labels else jax.nn.one_hot(lbl, C, axis=1,
                                                    dtype=jnp.float32)

        metric = IOUFunc(num_classes=C)
        iou, loss, cls_iou = metric(logits, targets)
        iou, loss, cls_iou = jax.block_until_ready((iou, loss, cls_iou))

        ref_iou, ref_cls = _reference_iou(logits, targets, C)
        assert abs(float(iou) - float(ref_iou)) < 1e-5, (case_id, float(iou),
                                                         float(ref_iou))
        assert bool(jnp.allclose(cls_iou, ref_cls, atol=1e-5)), case_id
        assert len(cls_iou) == C - 1

    run_case(2, 4, 16, 16, 0)               # aligned H*W, single tile, vreg counters
    run_case(2, 5, 15, 15, 1)               # H*W=225 -> lane pad + in-kernel mask
    run_case(1, 3, 48, 48, 2)               # S=18 -> multi-tile, ragged last tile
    run_case(2, 4, 16, 16, 3, labels=True)  # integer-label targets (C x fewer bytes)
    run_case(1, 16, 16, 16, 4)              # large-C fallback (VMEM slab path)
    print("KERNEL_OK")
</pallas_src>

<mosaic_0001>
module attributes {stable_mosaic.version = 11 : i64} {
  func.func @_iou_hist_kernel(%arg0: i32, %arg1: i32, %arg2: memref<1x4x2x128xf32, #tpu.memory_space<vmem>>, %arg3: memref<1x4x2x128xf32, #tpu.memory_space<vmem>>, %arg4: memref<1x12x1x128xi32, #tpu.memory_space<vmem>>) attributes {dimension_semantics = [#tpu.dimension_semantics<parallel>, #tpu.dimension_semantics<arbitrary>], iteration_bounds = array<i64: 2, 1>, scalar_prefetch = 0 : i64, scratch_operands = 0 : i64, tpu.core_type = #tpu.core_type<tc>, window_params = [{transform_indices = @transform_0, window_bounds = array<i64: 1, 4, 2, 128>}, {transform_indices = @transform_1, window_bounds = array<i64: 1, 4, 2, 128>}, {transform_indices = @transform_2, window_bounds = array<i64: 1, 12, 1, 128>}]} {
    %c0_i32 = arith.constant 0 : i32
    %0 = arith.cmpi eq, %arg1, %c0_i32 : i32
    %1 = arith.extui %0 : i1 to i32
    %c0_i32_0 = arith.constant 0 : i32
    %2 = arith.cmpi ne, %1, %c0_i32_0 : i32
    scf.if %2 {
      %c0_i32_137 = arith.constant 0 : i32
      %190 = vector.broadcast %c0_i32_137 : i32 to vector<12x1x128xi32>
      %c0_138 = arith.constant 0 : index
      %c0_139 = arith.constant 0 : index
      %c0_140 = arith.constant 0 : index
      %c0_141 = arith.constant 0 : index
      %191 = vector.load %arg4[%c0_138, %c0_139, %c0_140, %c0_141] : memref<1x12x1x128xi32, #tpu.memory_space<vmem>>, vector<1x12x1x128xi32>
      %192 = vector.shape_cast %191 : vector<1x12x1x128xi32> to vector<12x1x128xi32>
      %193 = vector.shape_cast %190 : vector<12x1x128xi32> to vector<1x12x1x128xi32>
      tpu.vector_store %arg4[%c0_138, %c0_139, %c0_140, %c0_141], %193 {strides = array<i32>} : memref<1x12x1x128xi32, #tpu.memory_space<vmem>>, vector<1x12x1x128xi32>,
    } else {
    }
    %c0_i32_1 = arith.constant 0 : i32
    %3 = vector.broadcast %c0_i32_1 : i32 to vector<2x128xi32>
    %c0_i32_2 = arith.constant 0 : i32
    %c2_i32 = arith.constant 2 : i32
    %4 = arith.muli %c0_i32_2, %c2_i32 : i32
    %5 = tpu.assume_multiple %4, 2 : i32
    %c0 = arith.constant 0 : index
    %c0_3 = arith.constant 0 : index
    %6 = arith.index_cast %5 : i32 to index
    %c0_4 = arith.constant 0 : index
    %7 = vector.load %arg2[%c0, %c0_3, %6, %c0_4] : memref<1x4x2x128xf32, #tpu.memory_space<vmem>>, vector<1x1x2x128xf32>
    %8 = vector.shape_cast %7 : vector<1x1x2x128xf32> to vector<2x128xf32>
    %c0_i32_5 = arith.constant 0 : i32
    %9 = vector.broadcast %c0_i32_5 : i32 to vector<2x128xi32>
    %c0_6 = arith.constant 0 : index
    %c0_7 = arith.constant 0 : index
    %10 = arith.index_cast %5 : i32 to index
    %c0_8 = arith.constant 0 : index
    %11 = vector.load %arg3[%c0_6, %c0_7, %10, %c0_8] : memref<1x4x2x128xf32, #tpu.memory_space<vmem>>, vector<1x1x2x128xf32>
    %12 = vector.shape_cast %11 : vector<1x1x2x128xf32> to vector<2x128xf32>
    %c0_i32_9 = arith.constant 0 : i32
    %13 = vector.broadcast %c0_i32_9 : i32 to vector<2x128xi32>
    %c0_10 = arith.constant 0 : index
    %c1 = arith.constant 1 : index
    %14 = arith.index_cast %5 : i32 to index
    %c0_11 = arith.constant 0 : index
    %15 = vector.load %arg2[%c0_10, %c1, %14, %c0_11] : memref<1x4x2x128xf32, #tpu.memory_space<vmem>>, vector<1x1x2x128xf32>
    %16 = vector.shape_cast %15 : vector<1x1x2x128xf32> to vector<2x128xf32>
    %17 = arith.cmpf ogt, %16, %8 : vector<2x128xf32>
    %18 = arith.select %17, %16, %8 : vector<2x128xi1>, vector<2x128xf32>
    %c1_i32 = arith.constant 1 : i32
    %19 = vector.broadcast %c1_i32 : i32 to vector<2x128xi32>
    %20 = arith.select %17, %19, %9 : vector<2x128xi1>, vector<2x128xi32>
    %c0_12 = arith.constant 0 : index
    %c1_13 = arith.constant 1 : index
    %21 = arith.index_cast %5 : i32 to index
    %c0_14 = arith.constant 0 : index
    %22 = vector.load %arg3[%c0_12, %c1_13, %21, %c0_14] : memref<1x4x2x128xf32, #tpu.memory_space<vmem>>, vector<1x1x2x128xf32>
    %23 = vector.shape_cast %22 : vector<1x1x2x128xf32> to vector<2x128xf32>
    %24 = arith.cmpf ogt, %23, %12 : vector<2x128xf32>
    %25 = arith.select %24, %23, %12 : vector<2x128xi1>, vector<2x128xf32>
    %c1_i32_15 = arith.constant 1 : i32
    %26 = vector.broadcast %c1_i32_15 : i32 to vector<2x128xi32>
    %27 = arith.select %24, %26, %13 : vector<2x128xi1>, vector<2x128xi32>
    %c0_16 = arith.constant 0 : index
    %c2 = arith.constant 2 : index
    %28 = arith.index_cast %5 : i32 to index
    %c0_17 = arith.constant 0 : index
    %29 = vector.load %arg2[%c0_16, %c2, %28, %c0_17] : memref<1x4x2x128xf32, #tpu.memory_space<vmem>>, vector<1x1x2x128xf32>
    %30 = vector.shape_cast %29 : vector<1x1x2x128xf32> to vector<2x128xf32>
    %31 = arith.cmpf ogt, %30, %18 : vector<2x128xf32>
    %32 = arith.select %31, %30, %18 : vector<2x128xi1>, vector<2x128xf32>
    %c2_i32_18 = arith.constant 2 : i32
    %33 = vector.broadcast %c2_i32_18 : i32 to vector<2x128xi32>
    %34 = arith.select %31, %33, %20 : vector<2x128xi1>, vector<2x128xi32>
    %c0_19 = arith.constant 0 : index
    %c2_20 = arith.constant 2 : index
    %35 = arith.index_cast %5 : i32 to index
    %c0_21 = arith.constant 0 : index
    %36 = vector.load %arg3[%c0_19, %c2_20, %35, %c0_21] : memref<1x4x2x128xf32, #tpu.memory_space<vmem>>, vector<1x1x2x128xf32>
    %37 = vector.shape_cast %36 : vector<1x1x2x128xf32> to vector<2x128xf32>
    %38 = arith.cmpf ogt, %37, %25 : vector<2x128xf32>
    %39 = arith.select %38, %37, %25 : vector<2x128xi1>, vector<2x128xf32>
    %c2_i32_22 = arith.constant 2 : i32
    %40 = vector.broadcast %c2_i32_22 : i32 to vector<2x128xi32>
    %41 = arith.select %38, %40, %27 : vector<2x128xi1>, vector<2x128xi32>
    %c0_23 = arith.constant 0 : index
    %c3 = arith.constant 3 : index
    %42 = arith.index_cast %5 : i32 to index
    %c0_24 = arith.constant 0 : index
    %43 = vector.load %arg2[%c0_23, %c3, %42, %c0_24] : memref<1x4x2x128xf32, #tpu.memory_space<vmem>>, vector<1x1x2x128xf32>
    %44 = vector.shape_cast %43 : vector<1x1x2x128xf32> to vector<2x128xf32>
    %45 = arith.cmpf ogt, %44, %32 : vector<2x128xf32>
    %c3_i32 = arith.constant 3 : i32
    %46 = vector.broadcast %c3_i32 : i32 to vector<2x128xi32>
    %47 = arith.select %45, %46, %34 : vector<2x128xi1>, vector<2x128xi32>
    %c0_25 = arith.constant 0 : index
    %c3_26 = arith.constant 3 : index
    %48 = arith.index_cast %5 : i32 to index
    %c0_27 = arith.constant 0 : index
    %49 = vector.load %arg3[%c0_25, %c3_26, %48, %c0_27] : memref<1x4x2x128xf32, #tpu.memory_space<vmem>>, vector<1x1x2x128xf32>
    %50 = vector.shape_cast %49 : vector<1x1x2x128xf32> to vector<2x128xf32>
    %51 = arith.cmpf ogt, %50, %39 : vector<2x128xf32>
    %c3_i32_28 = arith.constant 3 : i32
    %52 = vector.broadcast %c3_i32_28 : i32 to vector<2x128xi32>
    %53 = arith.select %51, %52, %41 : vector<2x128xi1>, vector<2x128xi32>
    %c0_i32_29 = arith.constant 0 : i32
    %54 = vector.broadcast %c0_i32_29 : i32 to vector<2x128xi32>
    %55 = arith.cmpi eq, %47, %54 : vector<2x128xi32>
    %56 = arith.extui %55 : vector<2x128xi1> to vector<2x128xi32>
    %c0_i32_30 = arith.constant 0 : i32
    %57 = vector.broadcast %c0_i32_30 : i32 to vector<2x128xi32>
    %58 = arith.cmpi eq, %53, %57 : vector<2x128xi32>
    %59 = arith.extui %58 : vector<2x128xi1> to vector<2x128xi32>
    %60 = arith.addi %3, %56 : vector<2x128xi32>
    %61 = arith.addi %3, %59 : vector<2x128xi32>
    %62 = arith.andi %56, %59 : vector<2x128xi32>
    %63 = arith.addi %3, %62 : vector<2x128xi32>
    %c1_i32_31 = arith.constant 1 : i32
    %64 = vector.broadcast %c1_i32_31 : i32 to vector<2x128xi32>
    %65 = arith.cmpi eq, %47, %64 : vector<2x128xi32>
    %66 = arith.extui %65 : vector<2x128xi1> to vector<2x128xi32>
    %c1_i32_32 = arith.constant 1 : i32
    %67 = vector.broadcast %c1_i32_32 : i32 to vector<2x128xi32>
    %68 = arith.cmpi eq, %53, %67 : vector<2x128xi32>
    %69 = arith.extui %68 : vector<2x128xi1> to vector<2x128xi32>
    %70 = arith.addi %3, %66 : vector<2x128xi32>
    %71 = arith.addi %3, %69 : vector<2x128xi32>
    %72 = arith.andi %66, %69 : vector<2x128xi32>
    %73 = arith.addi %3, %72 : vector<2x128xi32>
    %c2_i32_33 = arith.constant 2 : i32
    %74 = vector.broadcast %c2_i32_33 : i32 to vector<2x128xi32>
    %75 = arith.cmpi eq, %47, %74 : vector<2x128xi32>
    %76 = arith.extui %75 : vector<2x128xi1> to vector<2x128xi32>
    %c2_i32_34 = arith.constant 2 : i32
    %77 = vector.broadcast %c2_i32_34 : i32 to vector<2x128xi32>
    %78 = arith.cmpi eq, %53, %77 : vector<2x128xi32>
    %79 = arith.extui %78 : vector<2x128xi1> to vector<2x128xi32>
    %80 = arith.addi %3, %76 : vector<2x128xi32>
    %81 = arith.addi %3, %79 : vector<2x128xi32>
    %82 = arith.andi %76, %79 : vector<2x128xi32>
    %83 = arith.addi %3, %82 : vector<2x128xi32>
    %c3_i32_35 = arith.constant 3 : i32
    %84 = vector.broadcast %c3_i32_35 : i32 to vector<2x128xi32>
    %85 = arith.cmpi eq, %47, %84 : vector<2x128xi32>
    %86 = arith.extui %85 : vector<2x128xi1> to vector<2x128xi32>
    %c3_i32_36 = arith.constant 3 : i32
    %87 = vector.broadcast %c3_i32_36 : i32 to vector<2x128xi32>
    %88 = arith.cmpi eq, %53, %87 : vector<2x128xi32>
    %89 = arith.extui %88 : vector<2x128xi1> to vector<2x128xi32>
    %90 = arith.addi %3, %86 : vector<2x128xi32>
    %91 = arith.addi %3, %89 : vector<2x128xi32>
    %92 = arith.andi %86, %89 : vector<2x128xi32>
    %93 = arith.addi %3, %92 : vector<2x128xi32>
    %c1_i32_37 = arith.constant 1 : i32
    %c0_38 = arith.constant 0 : index
    %c0_39 = arith.constant 0 : index
    %c0_40 = arith.constant 0 : index
    %c0_41 = arith.constant 0 : index
    %94 = vector.load %arg4[%c0_38, %c0_39, %c0_40, %c0_41] : memref<1x12x1x128xi32, #tpu.memory_space<vmem>>, vector<1x1x1x128xi32>
    %95 = vector.shape_cast %94 : vector<1x1x1x128xi32> to vector<1x128xi32>
    %cst = arith.constant dense<0> : vector<128xi32>
    %96 = vector.multi_reduction <add>, %60, %cst [0] : vector<2x128xi32> to vector<128xi32>
    %97 = vector.shape_cast %96 : vector<128xi32> to vector<1x128xi32>
    %98 = arith.addi %95, %97 : vector<1x128xi32>
    %c0_42 = arith.constant 0 : index
    %c0_43 = arith.constant 0 : index
    %c0_44 = arith.constant 0 : index
    %c0_45 = arith.constant 0 : index
    %99 = vector.load %arg4[%c0_42, %c0_43, %c0_44, %c0_45] : memref<1x12x1x128xi32, #tpu.memory_space<vmem>>, vector<1x1x1x128xi32>
    %100 = vector.shape_cast %99 : vector<1x1x1x128xi32> to vector<1x128xi32>
    %101 = vector.shape_cast %98 : vector<1x128xi32> to vector<1x1x1x128xi32>
    tpu.vector_store %arg4[%c0_42, %c0_43, %c0_44, %c0_45], %101 {strides = array<i32>} : memref<1x12x1x128xi32, #tpu.memory_space<vmem>>, vector<1x1x1x128xi32>,
    %c0_46 = arith.constant 0 : index
    %c4 = arith.constant 4 : index
    %c0_47 = arith.constant 0 : index
    %c0_48 = arith.constant 0 : index
    %102 = vector.load %arg4[%c0_46, %c4, %c0_47, %c0_48] : memref<1x12x1x128xi32, #tpu.memory_space<vmem>>, vector<1x1x1x128xi32>
    %103 = vector.shape_cast %102 : vector<1x1x1x128xi32> to vector<1x128xi32>
    %cst_49 = arith.constant dense<0> : vector<128xi32>
    %104 = vector.multi_reduction <add>, %61, %cst_49 [0] : vector<2x128xi32> to vector<128xi32>
    %105 = vector.shape_cast %104 : vector<128xi32> to vector<1x128xi32>
    %106 = arith.addi %103, %105 : vector<1x128xi32>
    %c0_50 = arith.constant 0 : index
    %c4_51 = arith.constant 4 : index
    %c0_52 = arith.constant 0 : index
    %c0_53 = arith.constant 0 : index
    %107 = vector.load %arg4[%c0_50, %c4_51, %c0_52, %c0_53] : memref<1x12x1x128xi32, #tpu.memory_space<vmem>>, vector<1x1x1x128xi32>
    %108 = vector.shape_cast %107 : vector<1x1x1x128xi32> to vector<1x128xi32>
    %109 = vector.shape_cast %106 : vector<1x128xi32> to vector<1x1x1x128xi32>
    tpu.vector_store %arg4[%c0_50, %c4_51, %c0_52, %c0_53], %109 {strides = array<i32>} : memref<1x12x1x128xi32, #tpu.memory_space<vmem>>, vector<1x1x1x128xi32>,
    %c0_54 = arith.constant 0 : index
    %c8 = arith.constant 8 : index
    %c0_55 = arith.constant 0 : index
    %c0_56 = arith.constant 0 : index
    %110 = vector.load %arg4[%c0_54, %c8, %c0_55, %c0_56] : memref<1x12x1x128xi32, #tpu.memory_space<vmem>>, vector<1x1x1x128xi32>
    %111 = vector.shape_cast %110 : vector<1x1x1x128xi32> to vector<1x128xi32>
    %cst_57 = arith.constant dense<0> : vector<128xi32>
    %112 = vector.multi_reduction <add>, %63, %cst_57 [0] : vector<2x128xi32> to vector<128xi32>
    %113 = vector.shape_cast %112 : vector<128xi32> to vector<1x128xi32>
    %114 = arith.addi %111, %113 : vector<1x128xi32>
    %c0_58 = arith.constant 0 : index
    %c8_59 = arith.constant 8 : index
    %c0_60 = arith.constant 0 : index
    %c0_61 = arith.constant 0 : index
    %115 = vector.load %arg4[%c0_58, %c8_59, %c0_60, %c0_61] : memref<1x12x1x128xi32, #tpu.memory_space<vmem>>, vector<1x1x1x128xi32>
    %116 = vector.shape_cast %115 : vector<1x1x1x128xi32> to vector<1x128xi32>
    %117 = vector.shape_cast %114 : vector<1x128xi32> to vector<1x1x1x128xi32>
    tpu.vector_store %arg4[%c0_58, %c8_59, %c0_60, %c0_61], %117 {strides = array<i32>} : memref<1x12x1x128xi32, #tpu.memory_space<vmem>>, vector<1x1x1x128xi32>,
    %c0_62 = arith.constant 0 : index
    %c1_63 = arith.constant 1 : index
    %c0_64 = arith.constant 0 : index
    %c0_65 = arith.constant 0 : index
    %118 = vector.load %arg4[%c0_62, %c1_63, %c0_64, %c0_65] : memref<1x12x1x128xi32, #tpu.memory_space<vmem>>, vector<1x1x1x128xi32>
    %119 = vector.shape_cast %118 : vector<1x1x1x128xi32> to vector<1x128xi32>
    %cst_66 = arith.constant dense<0> : vector<128xi32>
    %120 = vector.multi_reduction <add>, %70, %cst_66 [0] : vector<2x128xi32> to vector<128xi32>
    %121 = vector.shape_cast %120 : vector<128xi32> to vector<1x128xi32>
    %122 = arith.addi %119, %121 : vector<1x128xi32>
    %c0_67 = arith.constant 0 : index
    %c1_68 = arith.constant 1 : index
    %c0_69 = arith.constant 0 : index
    %c0_70 = arith.constant 0 : index
    %123 = vector.load %arg4[%c0_67, %c1_68, %c0_69, %c0_70] : memref<1x12x1x128xi32, #tpu.memory_space<vmem>>, vector<1x1x1x128xi32>
    %124 = vector.shape_cast %123 : vector<1x1x1x128xi32> to vector<1x128xi32>
    %125 = vector.shape_cast %122 : vector<1x128xi32> to vector<1x1x1x128xi32>
    tpu.vector_store %arg4[%c0_67, %c1_68, %c0_69, %c0_70], %125 {strides = array<i32>} : memref<1x12x1x128xi32, #tpu.memory_space<vmem>>, vector<1x1x1x128xi32>,
    %c0_71 = arith.constant 0 : index
    %c5 = arith.constant 5 : index
    %c0_72 = arith.constant 0 : index
    %c0_73 = arith.constant 0 : index
    %126 = vector.load %arg4[%c0_71, %c5, %c0_72, %c0_73] : memref<1x12x1x128xi32, #tpu.memory_space<vmem>>, vector<1x1x1x128xi32>
    %127 = vector.shape_cast %126 : vector<1x1x1x128xi32> to vector<1x128xi32>
    %cst_74 = arith.constant dense<0> : vector<128xi32>
    %128 = vector.multi_reduction <add>, %71, %cst_74 [0] : vector<2x128xi32> to vector<128xi32>
    %129 = vector.shape_cast %128 : vector<128xi32> to vector<1x128xi32>
    %130 = arith.addi %127, %129 : vector<1x128xi32>
    %c0_75 = arith.constant 0 : index
    %c5_76 = arith.constant 5 : index
    %c0_77 = arith.constant 0 : index
    %c0_78 = arith.constant 0 : index
    %131 = vector.load %arg4[%c0_75, %c5_76, %c0_77, %c0_78] : memref<1x12x1x128xi32, #tpu.memory_space<vmem>>, vector<1x1x1x128xi32>
    %132 = vector.shape_cast %131 : vector<1x1x1x128xi32> to vector<1x128xi32>
    %133 = vector.shape_cast %130 : vector<1x128xi32> to vector<1x1x1x128xi32>
    tpu.vector_store %arg4[%c0_75, %c5_76, %c0_77, %c0_78], %133 {strides = array<i32>} : memref<1x12x1x128xi32, #tpu.memory_space<vmem>>, vector<1x1x1x128xi32>,
    %c0_79 = arith.constant 0 : index
    %c9 = arith.constant 9 : index
    %c0_80 = arith.constant 0 : index
    %c0_81 = arith.constant 0 : index
    %134 = vector.load %arg4[%c0_79, %c9, %c0_80, %c0_81] : memref<1x12x1x128xi32, #tpu.memory_space<vmem>>, vector<1x1x1x128xi32>
    %135 = vector.shape_cast %134 : vector<1x1x1x128xi32> to vector<1x128xi32>
    %cst_82 = arith.constant dense<0> : vector<128xi32>
    %136 = vector.multi_reduction <add>, %73, %cst_82 [0] : vector<2x128xi32> to vector<128xi32>
    %137 = vector.shape_cast %136 : vector<128xi32> to vector<1x128xi32>
    %138 = arith.addi %135, %137 : vector<1x128xi32>
    %c0_83 = arith.constant 0 : index
    %c9_84 = arith.constant 9 : index
    %c0_85 = arith.constant 0 : index
    %c0_86 = arith.constant 0 : index
    %139 = vector.load %arg4[%c0_83, %c9_84, %c0_85, %c0_86] : memref<1x12x1x128xi32, #tpu.memory_space<vmem>>, vector<1x1x1x128xi32>
    %140 = vector.shape_cast %139 : vector<1x1x1x128xi32> to vector<1x128xi32>
    %141 = vector.shape_cast %138 : vector<1x128xi32> to vector<1x1x1x128xi32>
    tpu.vector_store %arg4[%c0_83, %c9_84, %c0_85, %c0_86], %141 {strides = array<i32>} : memref<1x12x1x128xi32, #tpu.memory_space<vmem>>, vector<1x1x1x128xi32>,
    %c0_87 = arith.constant 0 : index
    %c2_88 = arith.constant 2 : index
    %c0_89 = arith.constant 0 : index
    %c0_90 = arith.constant 0 : index
    %142 = vector.load %arg4[%c0_87, %c2_88, %c0_89, %c0_90] : memref<1x12x1x128xi32, #tpu.memory_space<vmem>>, vector<1x1x1x128xi32>
    %143 = vector.shape_cast %142 : vector<1x1x1x128xi32> to vector<1x128xi32>
    %cst_91 = arith.constant dense<0> : vector<128xi32>
    %144 = vector.multi_reduction <add>, %80, %cst_91 [0] : vector<2x128xi32> to vector<128xi32>
    %145 = vector.shape_cast %144 : vector<128xi32> to vector<1x128xi32>
    %146 = arith.addi %143, %145 : vector<1x128xi32>
    %c0_92 = arith.constant 0 : index
    %c2_93 = arith.constant 2 : index
    %c0_94 = arith.constant 0 : index
    %c0_95 = arith.constant 0 : index
    %147 = vector.load %arg4[%c0_92, %c2_93, %c0_94, %c0_95] : memref<1x12x1x128xi32, #tpu.memory_space<vmem>>, vector<1x1x1x128xi32>
    %148 = vector.shape_cast %147 : vector<1x1x1x128xi32> to vector<1x128xi32>
    %149 = vector.shape_cast %146 : vector<1x128xi32> to vector<1x1x1x128xi32>
    tpu.vector_store %arg4[%c0_92, %c2_93, %c0_94, %c0_95], %149 {strides = array<i32>} : memref<1x12x1x128xi32, #tpu.memory_space<vmem>>, vector<1x1x1x128xi32>,
    %c0_96 = arith.constant 0 : index
    %c6 = arith.constant 6 : index
    %c0_97 = arith.constant 0 : index
    %c0_98 = arith.constant 0 : index
    %150 = vector.load %arg4[%c0_96, %c6, %c0_97, %c0_98] : memref<1x12x1x128xi32, #tpu.memory_space<vmem>>, vector<1x1x1x128xi32>
    %151 = vector.shape_cast %150 : vector<1x1x1x128xi32> to vector<1x128xi32>
    %cst_99 = arith.constant dense<0> : vector<128xi32>
    %152 = vector.multi_reduction <add>, %81, %cst_99 [0] : vector<2x128xi32> to vector<128xi32>
    %153 = vector.shape_cast %152 : vector<128xi32> to vector<1x128xi32>
    %154 = arith.addi %151, %153 : vector<1x128xi32>
    %c0_100 = arith.constant 0 : index
    %c6_101 = arith.constant 6 : index
    %c0_102 = arith.constant 0 : index
    %c0_103 = arith.constant 0 : index
    %155 = vector.load %arg4[%c0_100, %c6_101, %c0_102, %c0_103] : memref<1x12x1x128xi32, #tpu.memory_space<vmem>>, vector<1x1x1x128xi32>
    %156 = vector.shape_cast %155 : vector<1x1x1x128xi32> to vector<1x128xi32>
    %157 = vector.shape_cast %154 : vector<1x128xi32> to vector<1x1x1x128xi32>
    tpu.vector_store %arg4[%c0_100, %c6_101, %c0_102, %c0_103], %157 {strides = array<i32>} : memref<1x12x1x128xi32, #tpu.memory_space<vmem>>, vector<1x1x1x128xi32>,
    %c0_104 = arith.constant 0 : index
    %c10 = arith.constant 10 : index
    %c0_105 = arith.constant 0 : index
    %c0_106 = arith.constant 0 : index
    %158 = vector.load %arg4[%c0_104, %c10, %c0_105, %c0_106] : memref<1x12x1x128xi32, #tpu.memory_space<vmem>>, vector<1x1x1x128xi32>
    %159 = vector.shape_cast %158 : vector<1x1x1x128xi32> to vector<1x128xi32>
    %cst_107 = arith.constant dense<0> : vector<128xi32>
    %160 = vector.multi_reduction <add>, %83, %cst_107 [0] : vector<2x128xi32> to vector<128xi32>
    %161 = vector.shape_cast %160 : vector<128xi32> to vector<1x128xi32>
    %162 = arith.addi %159, %161 : vector<1x128xi32>
    %c0_108 = arith.constant 0 : index
    %c10_109 = arith.constant 10 : index
    %c0_110 = arith.constant 0 : index
    %c0_111 = arith.constant 0 : index
    %163 = vector.load %arg4[%c0_108, %c10_109, %c0_110, %c0_111] : memref<1x12x1x128xi32, #tpu.memory_space<vmem>>, vector<1x1x1x128xi32>
    %164 = vector.shape_cast %163 : vector<1x1x1x128xi32> to vector<1x128xi32>
    %165 = vector.shape_cast %162 : vector<1x128xi32> to vector<1x1x1x128xi32>
    tpu.vector_store %arg4[%c0_108, %c10_109, %c0_110, %c0_111], %165 {strides = array<i32>} : memref<1x12x1x128xi32, #tpu.memory_space<vmem>>, vector<1x1x1x128xi32>,
    %c0_112 = arith.constant 0 : index
    %c3_113 = arith.constant 3 : index
    %c0_114 = arith.constant 0 : index
    %c0_115 = arith.constant 0 : index
    %166 = vector.load %arg4[%c0_112, %c3_113, %c0_114, %c0_115] : memref<1x12x1x128xi32, #tpu.memory_space<vmem>>, vector<1x1x1x128xi32>
    %167 = vector.shape_cast %166 : vector<1x1x1x128xi32> to vector<1x128xi32>
    %cst_116 = arith.constant dense<0> : vector<128xi32>
    %168 = vector.multi_reduction <add>, %90, %cst_116 [0] : vector<2x128xi32> to vector<128xi32>
    %169 = vector.shape_cast %168 : vector<128xi32> to vector<1x128xi32>
    %170 = arith.addi %167, %169 : vector<1x128xi32>
    %c0_117 = arith.constant 0 : index
    %c3_118 = arith.constant 3 : index
    %c0_119 = arith.constant 0 : index
    %c0_120 = arith.constant 0 : index
    %171 = vector.load %arg4[%c0_117, %c3_118, %c0_119, %c0_120] : memref<1x12x1x128xi32, #tpu.memory_space<vmem>>, vector<1x1x1x128xi32>
    %172 = vector.shape_cast %171 : vector<1x1x1x128xi32> to vector<1x128xi32>
    %173 = vector.shape_cast %170 : vector<1x128xi32> to vector<1x1x1x128xi32>
    tpu.vector_store %arg4[%c0_117, %c3_118, %c0_119, %c0_120], %173 {strides = array<i32>} : memref<1x12x1x128xi32, #tpu.memory_space<vmem>>, vector<1x1x1x128xi32>,
    %c0_121 = arith.constant 0 : index
    %c7 = arith.constant 7 : index
    %c0_122 = arith.constant 0 : index
    %c0_123 = arith.constant 0 : index
    %174 = vector.load %arg4[%c0_121, %c7, %c0_122, %c0_123] : memref<1x12x1x128xi32, #tpu.memory_space<vmem>>, vector<1x1x1x128xi32>
    %175 = vector.shape_cast %174 : vector<1x1x1x128xi32> to vector<1x128xi32>
    %cst_124 = arith.constant dense<0> : vector<128xi32>
    %176 = vector.multi_reduction <add>, %91, %cst_124 [0] : vector<2x128xi32> to vector<128xi32>
    %177 = vector.shape_cast %176 : vector<128xi32> to vector<1x128xi32>
    %178 = arith.addi %175, %177 : vector<1x128xi32>
    %c0_125 = arith.constant 0 : index
    %c7_126 = arith.constant 7 : index
    %c0_127 = arith.constant 0 : index
    %c0_128 = arith.constant 0 : index
    %179 = vector.load %arg4[%c0_125, %c7_126, %c0_127, %c0_128] : memref<1x12x1x128xi32, #tpu.memory_space<vmem>>, vector<1x1x1x128xi32>
    %180 = vector.shape_cast %179 : vector<1x1x1x128xi32> to vector<1x128xi32>
    %181 = vector.shape_cast %178 : vector<1x128xi32> to vector<1x1x1x128xi32>
    tpu.vector_store %arg4[%c0_125, %c7_126, %c0_127, %c0_128], %181 {strides = array<i32>} : memref<1x12x1x128xi32, #tpu.memory_space<vmem>>, vector<1x1x1x128xi32>,
    %c0_129 = arith.constant 0 : index
    %c11 = arith.constant 11 : index
    %c0_130 = arith.constant 0 : index
    %c0_131 = arith.constant 0 : index
    %182 = vector.load %arg4[%c0_129, %c11, %c0_130, %c0_131] : memref<1x12x1x128xi32, #tpu.memory_space<vmem>>, vector<1x1x1x128xi32>
    %183 = vector.shape_cast %182 : vector<1x1x1x128xi32> to vector<1x128xi32>
    %cst_132 = arith.constant dense<0> : vector<128xi32>
    %184 = vector.multi_reduction <add>, %93, %cst_132 [0] : vector<2x128xi32> to vector<128xi32>
    %185 = vector.shape_cast %184 : vector<128xi32> to vector<1x128xi32>
    %186 = arith.addi %183, %185 : vector<1x128xi32>
    %c0_133 = arith.constant 0 : index
    %c11_134 = arith.constant 11 : index
    %c0_135 = arith.constant 0 : index
    %c0_136 = arith.constant 0 : index
    %187 = vector.load %arg4[%c0_133, %c11_134, %c0_135, %c0_136] : memref<1x12x1x128xi32, #tpu.memory_space<vmem>>, vector<1x1x1x128xi32>
    %188 = vector.shape_cast %187 : vector<1x1x1x128xi32> to vector<1x128xi32>
    %189 = vector.shape_cast %186 : vector<1x128xi32> to vector<1x1x1x128xi32>
    tpu.vector_store %arg4[%c0_133, %c11_134, %c0_135, %c0_136], %189 {strides = array<i32>} : memref<1x12x1x128xi32, #tpu.memory_space<vmem>>, vector<1x1x1x128xi32>,
    return
  }
  func.func @transform_0(%arg0: i32, %arg1: i32) -> (i32, i32, i32, i32) {
    %c0_i32 = arith.constant 0 : i32
    %c0_i32_0 = arith.constant 0 : i32
    %c0_i32_1 = arith.constant 0 : i32
    return %arg0, %c0_i32, %arg1, %c0_i32_0 : i32, i32, i32, i32
  }
  func.func @transform_1(%arg0: i32, %arg1: i32) -> (i32, i32, i32, i32) {
    %c0_i32 = arith.constant 0 : i32
    %c0_i32_0 = arith.constant 0 : i32
    %c0_i32_1 = arith.constant 0 : i32
    return %arg0, %c0_i32, %arg1, %c0_i32_0 : i32, i32, i32, i32
  }
  func.func @transform_2(%arg0: i32, %arg1: i32) -> (i32, i32, i32, i32) {
    %c0_i32 = arith.constant 0 : i32
    %c0_i32_0 = arith.constant 0 : i32
    %c0_i32_1 = arith.constant 0 : i32
    %c0_i32_2 = arith.constant 0 : i32
    return %arg0, %c0_i32, %c0_i32_0, %c0_i32_1 : i32, i32, i32, i32
  }
}

</mosaic_0001>

<bundles_post_ra>
// kernel: fwd.1
= control target key start
LH: loop header
LB: loop body
LE: loop exit
PB: predicated region body
PF: predicated region fallthrough
CT: control target
= control target key end

     0   :  { %s599_s9 = smov 0   ;;  %s601_s10 = smov 0   ;;  %s735_s0 = inlined_call_operand.vmem [shape: f32[2,4,2,128], index: 0, kind: input, shape index: {}]   ;;  %s736_s1 = inlined_call_operand.vmem [shape: f32[2,4,2,128], index: 1, kind: input, shape index: {}]   ;;  %s737_s2 = inlined_call_operand.vmem [shape: s32[2,12,1,128], index: 2, kind: output, shape index: {}]  }
   0x1   :  { %s603_s11 = smov 0  }
   0x2 LB: > { %s24_s12 = sadd.s32 1, %s577_s10  ;;  %p496_p0 = scmp.ge.s32.totalorder %s581_s11, 1  ;;  %s581_s11 = sphi %s603_s11, %s12_s11   ;;  %s577_s10 = sphi %s601_s10, %s739_s10   ;;  %s573_s9 = sphi %s599_s9, %s738_s9  }
   0x3   : > { %p26_p1 = scmp.ge.s32.totalorder %s24_s12, 2  ;;  %p144_p2 = scmp.lt.s32.totalorder %s581_s11, 3 }
   0x5   : > { %s741_s12 = smov (%p26_p1, %s24_s12), 0  ;;  %p145_p3 = pnand %p496_p0, %p144_p2 }
   0x6   : > { %p176_p4 = scmp.lt.s32.totalorder (!%p145_p3), %s573_s9, 1  ;;  %v583_v3 = vmov (!%p145_p3), 0   ;;  %vm270_vm5 = vcmask (!%p145_p3), 1041408  }
   0x7   : > { %148 = sbr.rel (%p145_p3) target bundleno = 64 (0x40), region = 28 }
   0xe   : > { %s743_s9 = smov (!%p176_p4, %s573_s9), 1 }
   0xf   : > { %s533_s13 = smul.u32 12, %s743_s9  ;;  %s531_s14 = sshll.u32 %s743_s9, 3 }
  0x10   : > { %s183_s17 = scalar_lea.vmem %s735_s0, %s531_s14  ;;  %s191_s20 = scalar_lea.vmem %s736_s1, %s531_s14 }
  0x11   : > { %s626_s23 = scalar_lea.vmem %s737_s2, %s533_s13  ;;  %v212_v0 = vld [vmem:[%s183_s17] sm:$0x3]  ;;  %v501_v1 = vld [vmem:[%s183_s17 + $0x2] sm:$0x3]  ;;  %v503_v2 = vld [vmem:[%s183_s17 + $0x4] sm:$0x3] }
  0x12   : > { %200 = vst [vmem:[%s626_s23] sm:$0x1] %v583_v3  ;;  %201 = vst [vmem:[%s626_s23 + $0x1] sm:$0x1] %v583_v3  ;;  %vm217_vm0 = vcmp.gt.f32.partialorder %v501_v1, %v212_v0  ;;  %v213_v4 = vld [vmem:[%s191_s20] sm:$0x3] }
  0x13   : > { %202 = vst [vmem:[%s626_s23 + $0x2] sm:$0x1] %v583_v3  ;;  %203 = vst [vmem:[%s626_s23 + $0x3] sm:$0x1] %v583_v3  ;;  %v502_v5 = vld [vmem:[%s191_s20 + $0x2] sm:$0x3]  ;;  %v218_v6 = vsel %vm217_vm0, %v501_v1, %v212_v0 }
  0x14   : > { %204 = vst [vmem:[%s626_s23 + $0x4] sm:$0x1] %v583_v3  ;;  %205 = vst [vmem:[%s626_s23 + $0x5] sm:$0x1] %v583_v3  ;;  %v219_v7 = vsel %vm217_vm0, 1, %v583_v3  ;;  %vm222_vm1 = vcmp.gt.f32.partialorder %v502_v5, %v213_v4  ;;  %vm228_vm2 = vcmp.gt.f32.partialorder %v503_v2, %v218_v6 }
  0x15   : > { %206 = vst [vmem:[%s626_s23 + $0x6] sm:$0x1] %v583_v3  ;;  %207 = vst [vmem:[%s626_s23 + $0x7] sm:$0x1] %v583_v3  ;;  %v505_v8 = vld [vmem:[%s183_s17 + $0x6] sm:$0x3]  ;;  %v223_v10 = vsel %vm222_vm1, %v502_v5, %v213_v4  ;;  %v229_v13 = vsel %vm228_vm2, %v503_v2, %v218_v6 }
  0x16   : > { %208 = vst [vmem:[%s626_s23 + $0x8] sm:$0x1] %v583_v3  ;;  %209 = vst [vmem:[%s626_s23 + $0x9] sm:$0x1] %v583_v3  ;;  %v504_v9 = vld [vmem:[%s191_s20 + $0x4] sm:$0x3]  ;;  %vm239_vm4 = vcmp.gt.f32.partialorder %v505_v8, %v229_v13 }
  0x17   : > { %210 = vst [vmem:[%s626_s23 + $0xa] sm:$0x1] %v583_v3  ;;  %211 = vst [vmem:[%s626_s23 + $0xb] sm:$0x1] %v583_v3  ;;  %v224_v11 = vsel %vm222_vm1, 1, %v583_v3  ;;  %v230_v14 = vsel %vm228_vm2, 2, %v219_v7  ;;  %vm233_vm3 = vcmp.gt.f32.partialorder %v504_v9, %v223_v10 }
  0x18   : > { %v506_v12 = vld [vmem:[%s191_s20 + $0x6] sm:$0x3]  ;;  %v234_v15 = vsel %vm233_vm3, %v504_v9, %v223_v10  ;;  %v235_v16 = vsel %vm233_vm3, 2, %v224_v11  ;;  %v654_v17 = vsel %vm239_vm4, 3, %v230_v14 }
  0x19   : > { %vm243_vm6 = vcmp.gt.f32.partialorder %v506_v12, %v234_v15  ;;  %vm245_vm7 = vcmp.eq.s32.totalorder %v654_v17, 0  ;;  %vm251_vm8 = vcmp.eq.s32.totalorder %v654_v17, 1  ;;  %vm257_vm10 = vcmp.eq.s32.totalorder %v654_v17, 2  ;;  %v269_v58 = vld [vmem:[%s626_s23] sm:$0x1] }
  0x1a   : > { %v657_v18 = vsel %vm243_vm6, 3, %v235_v16  ;;  %v246_v19 = vsel %vm245_vm7, 1, %v583_v3  ;;  %v252_v22 = vsel %vm251_vm8, 1, %v583_v3  ;;  %v258_v42 = vsel %vm257_vm10, 1, %v583_v3  ;;  %v511_v2 = vld [vmem:[%s626_s23 + $0x1] sm:$0x1] }
  0x1b   : > { %vm247_vm9 = vcmp.eq.s32.totalorder %v657_v18, 0  ;;  %v271_v20 = vsel %vm270_vm5, %v246_v19, 0  ;;  %vm253_vm12 = vcmp.eq.s32.totalorder %v657_v18, 1  ;;  %v304_v26 = vsel %vm270_vm5, %v252_v22, 0  ;;  %v507_v0 = vld [vmem:[%s626_s23 + $0x4] sm:$0x1] }
  0x1c   : > { %v248_v21 = vsel %vm247_vm9, 1, %v583_v3  ;;  %vm249_vm11 = vmand %vm245_vm7, %vm247_vm9  ;;  %v272_v23 = vrot.slane %v271_v20, 4  ;;  %v305_v29 = vrot.slane %v304_v26, 4  ;;  %v254_v30 = vsel %vm253_vm12, 1, %v583_v3  ;;  %v513_v13 = vld [vmem:[%s626_s23 + $0x5] sm:$0x1] }
  0x1d   : > { %v282_v24 = vsel %vm270_vm5, %v248_v21, 0  ;;  %v250_v25 = vsel %vm249_vm11, 1, %v583_v3  ;;  %vm255_vm13 = vmand %vm251_vm8, %vm253_vm12  ;;  %v315_v33 = vsel %vm270_vm5, %v254_v30, 0  ;;  %v337_v46 = vsel %vm270_vm5, %v258_v42, 0  ;;  %v509_v7 = vld [vmem:[%s626_s23 + $0x8] sm:$0x1] }
  0x1e   : > { %v283_v27 = vrot.slane %v282_v24, 4  ;;  %v293_v28 = vsel %vm270_vm5, %v250_v25, 0  ;;  %v273_v31 = vadd.s32 %v272_v23, %v271_v20  ;;  %v256_v34 = vsel %vm255_vm13, 1, %v583_v3  ;;  %v515_v21 = vld [vmem:[%s626_s23 + $0x9] sm:$0x1] }
  0x1f   : > { %v294_v32 = vrot.slane %v293_v28, 4  ;;  %v306_v36 = vadd.s32 %v305_v29, %v304_v26  ;;  %v316_v37 = vrot.slane %v315_v33, 4  ;;  %v326_v38 = vsel %vm270_vm5, %v256_v34, 0 }
  0x20   : > { %v284_v35 = vadd.s32 %v283_v27, %v282_v24  ;;  %v274_v39 = vrot.slane %v273_v31, 2  ;;  %v327_v41 = vrot.slane %v326_v38, 4  ;;  %v338_v50 = vrot.slane %v337_v46, 4 }
  0x21   : > { %v295_v40 = vadd.s32 %v294_v32, %v293_v28  ;;  %v307_v44 = vrot.slane %v306_v36, 2  ;;  %v317_v45 = vadd.s32 %v316_v37, %v315_v33  ;;  %vm259_vm14 = vcmp.eq.s32.totalorder %v657_v18, 2  ;;  %v517_v28 = vld [vmem:[%s626_s23 + $0x2] sm:$0x1] }
  0x22   : > { %v285_v43 = vrot.slane %v284_v35, 2  ;;  %v275_v47 = vadd.s32 %v274_v39, %v273_v31  ;;  %v328_v49 = vadd.s32 %v327_v41, %v326_v38  ;;  %v339_v57 = vadd.s32 %v338_v50, %v337_v46  ;;  %vm261_vm15 = vmand %vm257_vm10, %vm259_vm14 }
  0x23   : > { %v296_v48 = vrot.slane %v295_v40, 2  ;;  %v308_v52 = vadd.s32 %v307_v44, %v306_v36  ;;  %v318_v53 = vrot.slane %v317_v45, 2  ;;  %v260_v62 = vsel %vm259_vm14, 1, %v583_v3 }
  0x24   : > { %v286_v51 = vadd.s32 %v285_v43, %v284_v35  ;;  %v276_v54 = vrot.slane %v275_v47, 1  ;;  %v329_v56 = vrot.slane %v328_v49, 2  ;;  %v340_v5 = vrot.slane %v339_v57, 2 }
  0x25   : > { %v297_v55 = vadd.s32 %v296_v48, %v295_v40  ;;  %v309_v60 = vrot.slane %v308_v52, 1  ;;  %v319_v61 = vadd.s32 %v318_v53, %v317_v45  ;;  %v348_v10 = vsel %vm270_vm5, %v260_v62, 0  ;;  %v523_v62 = vld [vmem:[%s626_s23 + $0x3] sm:$0x1] }
  0x26   : > { %v287_v59 = vrot.slane %v286_v51, 1  ;;  %v277_v63 = vadd.s32 %v276_v54, %v275_v47  ;;  %v330_v4 = vadd.s32 %v329_v56, %v328_v49  ;;  %v341_v15 = vadd.s32 %v340_v5, %v339_v57  ;;  %v519_v49 = vld [vmem:[%s626_s23 + $0x6] sm:$0x1]  ;;  %v521_v57 = vld [vmem:[%s626_s23 + $0xa] sm:$0x1] }
  0x27   : > { %v298_v1 = vrot.slane %v297_v55, 1  ;;  %v310_v8 = vadd.s32 %v309_v60, %v308_v52  ;;  %v320_v9 = vrot.slane %v319_v61, 1  ;;  %v349_v22 = vrot.slane %v348_v10, 4 }
  0x28   : > { %v288_v6 = vadd.s32 %v287_v59, %v286_v51  ;;  %v278_v11 = vadd.s32 %v277_v63, %v269_v58  ;;  %v331_v14 = vrot.slane %v330_v4, 1  ;;  %v342_v25 = vrot.slane %v341_v15, 1 }
  0x29   : > { %v299_v12 = vadd.s32 %v298_v1, %v297_v55  ;;  %v311_v19 = vadd.s32 %v511_v2, %v310_v8  ;;  %v321_v20 = vadd.s32 %v320_v9, %v319_v61  ;;  %v262_v26 = vsel %vm261_vm15, 1, %v583_v3  ;;  %v527_v8 = vld [vmem:[%s626_s23 + $0xb] sm:$0x1] }
  0x2a   : > { %v289_v16 = vadd.s32 %v507_v0, %v288_v6  ;;  %279 = vst [vmem:[%s626_s23] sm:$0x1] %v278_v11  ;;  %v332_v24 = vadd.s32 %v331_v14, %v330_v4  ;;  %v350_v29 = vadd.s32 %v349_v22, %v348_v10  ;;  %v359_v30 = vsel %vm270_vm5, %v262_v26, 0  ;;  %v525_v4 = vld [vmem:[%s626_s23 + $0x7] sm:$0x1] }
  0x2b   : > { %v300_v23 = vadd.s32 %v509_v7, %v299_v12  ;;  %512 = vst [vmem:[%s626_s23 + $0x1] sm:$0x1] %v311_v19  ;;  %v322_v27 = vadd.s32 %v513_v13, %v321_v20  ;;  %vm263_vm0 = vcmp.eq.s32.totalorder %v654_v17, 3  ;;  %v343_v32 = vadd.s32 %v342_v25, %v341_v15 }
  0x2c   : > { %508 = vst [vmem:[%s626_s23 + $0x4] sm:$0x1] %v289_v16  ;;  %v333_v31 = vadd.s32 %v515_v21, %v332_v24  ;;  %v360_v33 = vrot.slane %v359_v30, 4  ;;  %v264_v34 = vsel %vm263_vm0, 1, %v583_v3  ;;  %v351_v35 = vrot.slane %v350_v29, 2 }
  0x2d   : > { %510 = vst [vmem:[%s626_s23 + $0x8] sm:$0x1] %v300_v23  ;;  %514 = vst [vmem:[%s626_s23 + $0x5] sm:$0x1] %v322_v27  ;;  %v370_v36 = vsel %vm270_vm5, %v264_v34, 0  ;;  %vm265_vm1 = vcmp.eq.s32.totalorder %v657_v18, 3  ;;  %v344_v37 = vadd.s32 %v517_v28, %v343_v32 }
  0x2e   : > { %516 = vst [vmem:[%s626_s23 + $0x9] sm:$0x1] %v333_v31  ;;  %v361_v38 = vadd.s32 %v360_v33, %v359_v30  ;;  %v371_v39 = vrot.slane %v370_v36, 4  ;;  %v266_v40 = vsel %vm265_vm1, 1, %v583_v3  ;;  %vm267_vm2 = vmand %vm263_vm0, %vm265_vm1  ;;  %v352_v41 = vadd.s32 %v351_v35, %v350_v29 }
  0x2f   : > { %v381_v42 = vsel %vm270_vm5, %v266_v40, 0  ;;  %v268_v43 = vsel %vm267_vm2, 1, %v583_v3  ;;  %518 = vst [vmem:[%s626_s23 + $0x2] sm:$0x1] %v344_v37 }
  0x30   : > { %v362_v44 = vrot.slane %v361_v38, 2  ;;  %v372_v45 = vadd.s32 %v371_v39, %v370_v36  ;;  %v382_v18 = vrot.slane %v381_v42, 4  ;;  %v392_v46 = vsel %vm270_vm5, %v268_v43, 0 }
  0x31   : > { %v353_v47 = vrot.slane %v352_v41, 1  ;;  %v393_v48 = vrot.slane %v392_v46, 4 }
  0x32   : > { %v363_v50 = vadd.s32 %v362_v44, %v361_v38  ;;  %v373_v17 = vrot.slane %v372_v45, 2  ;;  %v383_v51 = vadd.s32 %v382_v18, %v381_v42 }
  0x33   : > { %v354_v52 = vadd.s32 %v353_v47, %v352_v41  ;;  %v394_v53 = vadd.s32 %v393_v48, %v392_v46 }
  0x34   : > { %v364_v54 = vrot.slane %v363_v50, 1  ;;  %v374_v3 = vadd.s32 %v373_v17, %v372_v45  ;;  %v384_v55 = vrot.slane %v383_v51, 2 }
  0x35   : > { %v355_v56 = vadd.s32 %v519_v49, %v354_v52  ;;  %v395_v58 = vrot.slane %v394_v53, 2 }
  0x36   : > { %v365_v59 = vadd.s32 %v364_v54, %v363_v50  ;;  %v375_v60 = vrot.slane %v374_v3, 1  ;;  %v385_v61 = vadd.s32 %v384_v55, %v383_v51 }
  0x37   : > { %520 = vst [vmem:[%s626_s23 + $0x6] sm:$0x1] %v355_v56  ;;  %v396_v63 = vadd.s32 %v395_v58, %v394_v53 }
  0x38   : > { %v366_v0 = vadd.s32 %v521_v57, %v365_v59  ;;  %v376_v1 = vadd.s32 %v375_v60, %v374_v3  ;;  %v386_v2 = vrot.slane %v385_v61, 1 }
  0x39   : > { %v397_v5 = vrot.slane %v396_v63, 1 }
  0x3a   : > { %522 = vst [vmem:[%s626_s23 + $0xa] sm:$0x1] %v366_v0  ;;  %v377_v6 = vadd.s32 %v523_v62, %v376_v1  ;;  %v387_v7 = vadd.s32 %v386_v2, %v385_v61 }
  0x3b   : > { %v398_v9 = vadd.s32 %v397_v5, %v396_v63 }
  0x3c   : > { %524 = vst [vmem:[%s626_s23 + $0x3] sm:$0x1] %v377_v6  ;;  %v388_v10 = vadd.s32 %v525_v4, %v387_v7 }
  0x3d   : > { %v399_v11 = vadd.s32 %v527_v8, %v398_v9 }
  0x3e   : > { %526 = vst [vmem:[%s626_s23 + $0x7] sm:$0x1] %v388_v10 }
  0x3f   : > { %528 = vst [vmem:[%s626_s23 + $0xb] sm:$0x1] %v399_v11 }
  0x40 PF: > { %s12_s11 = sadd.s32 1, %s581_s11   ;;  %s738_s9 = smov %s577_s10 }
  0x41   : > { %p9_p5 = scmp.ge.s32.totalorder %s12_s11, 4   ;;  %s739_s10 = smov %s741_s12 }
  0x43   :  { %11 = sbr.rel (!%p9_p5) target bundleno = 2 (0x2), region = 82 }

</bundles_post_ra>
